<compile_context>
chip_gen: v7x
topology: tpu7x:2x2x1
jax: 0.10.0
libtpu: 0.0.40
codegen_flags: <defaults>
</compile_context>

<pallas_src>
import jax
import jax.numpy as jnp
import numpy as np
from jax.experimental import pallas as pl
from jax.experimental.pallas import tpu as pltpu


def _round_up(a: int, b: int) -> int:
    return ((a + b - 1) // b) * b


# ----------------------------- Pallas kernel --------------------------------

def _grouped_expert_kernel(gid_ref, rows_ref, xs_ref, rw_ref,
                           w1_ref, w3_ref, w2_ref, ys_ref, acc_ref):
    """One (row-tile, H-tile) step of the grouped expert FFN.

    gid_ref  : (num_tiles,) int32 SMEM — expert id per tile (used by index_maps)
    rows_ref : (num_tiles,) int32 SMEM — valid rows per tile (0 => padding tile)
    xs_ref   : (tm, D)  gathered tokens for this tile (bf16)
    rw_ref   : (tm, 1)  f32 routing weights (0 on padded rows)
    w1_ref   : (D, tH)  W1 H-slice of this tile's expert
    w3_ref   : (D, tH)  W3 H-slice
    w2_ref   : (tH, D)  W2 H-slice
    ys_ref   : (tm, D)  weighted expert output rows (bf16), written at last h
    acc_ref  : (tm, D)  f32 VMEM accumulator across H tiles
    """
    del gid_ref
    t = pl.program_id(0)
    h = pl.program_id(1)

    @pl.when(h == 0)
    def _():
        acc_ref[...] = jnp.zeros_like(acc_ref)

    @pl.when(rows_ref[t] > 0)          # skip MXU work on padding-only tiles
    def _():
        x = xs_ref[...]
        h1 = jnp.dot(x, w1_ref[...], preferred_element_type=jnp.float32)  # (tm, tH)
        h3 = jnp.dot(x, w3_ref[...], preferred_element_type=jnp.float32)  # (tm, tH)
        g = (h1 * jax.nn.sigmoid(h1)) * h3                                 # SwiGLU, f32
        acc_ref[...] += jnp.dot(g.astype(w2_ref.dtype), w2_ref[...],
                                preferred_element_type=jnp.float32)

    @pl.when(h == pl.num_programs(1) - 1)
    def _():
        rw = rw_ref[...]                                  # (tm, 1) f32
        acc = acc_ref[...]                                # (tm, D) f32
        # where-mask (not just 0*acc) so padded rows are exact zeros even if an
        # expert output row overflowed to inf/NaN.
        ys_ref[...] = jnp.where(rw > 0.0, acc * rw, 0.0).astype(ys_ref.dtype)


# ------------------------------- Wrapper -------------------------------------

def moe_pallas(x, wg, w1, w3, w2, num_experts_per_tok, *,
               tm=256, tH=512, compute_dtype=jnp.bfloat16,
               vmem_limit_bytes=48 * 1024 * 1024, weight_buffers=2):
    """MoE forward.  x:(T,D)  wg:(D,E)  w1,w3:(E,D,H)  w2:(E,H,D).

    tm: row tile (MXU M dim) — 128 on v5e, 256 on v6e/v7x; must be %16 (bf16).
    tH: hidden tile — <=512 (mult of 256) on v7x (64 MiB VMEM); ~1024 on v5e/v6e.
    vmem_limit_bytes: ~48 MiB is safe on all gens; raise toward 64-96 MiB on
    v5e/v6e (128 MiB physical) for bigger tiles / deeper buffering.
    weight_buffers: set 3 on v5e/v6e to hide the expert-boundary weight fetch.
    """
    T, D = x.shape
    E, _, H = w1.shape
    k = num_experts_per_tok
    assert tm % 16 == 0, "tm must be a multiple of 16 for bf16 sublane packing"
    assert D % 128 == 0 and tH % 128 == 0 and H % tH == 0

    # ---------------- gating / routing (XLA glue; f32 logits through top_k) ----
    logits = jnp.dot(x, wg, preferred_element_type=jnp.float32)        # (T, E) f32
    top_vals, top_idx = jax.lax.top_k(logits, k)                       # (T, k)
    probs = jax.nn.softmax(top_vals, axis=-1)                          # (T, k) f32

    # Flatten (token, j) assignments and sort by expert id.
    flat_e = top_idx.reshape(-1).astype(jnp.int32)                     # (T*k,)
    flat_t = jnp.repeat(jnp.arange(T, dtype=jnp.int32), k)             # (T*k,)
    flat_w = probs.reshape(-1)                                         # (T*k,) f32
    order = jnp.argsort(flat_e)
    se, st, sw = flat_e[order], flat_t[order], flat_w[order]

    # Pad each expert group to a multiple of tm so every row tile maps to exactly
    # one expert.  R is a static upper bound on the padded row count.
    counts = jnp.bincount(flat_e, length=E)                            # (E,)
    padded = ((counts + tm - 1) // tm) * tm                            # (E,)
    grp_start = jnp.cumsum(padded) - padded                            # padded starts
    pos = jnp.arange(T * k, dtype=jnp.int32) - (jnp.cumsum(counts) - counts)[se]
    slot = (grp_start[se] + pos).astype(jnp.int32)                     # unique slots

    R = _round_up(T * k + E * (tm - 1), tm)                            # static
    num_tiles = R // tm
    num_h = H // tH

    tok = jnp.zeros((R,), jnp.int32).at[slot].set(st)        # gather idx (pad -> 0)
    rw = jnp.zeros((R,), jnp.float32).at[slot].set(sw).reshape(R, 1)   # pad -> 0

    tile_off = jnp.arange(num_tiles, dtype=jnp.int32) * tm
    tile_gid = jnp.minimum(
        jnp.searchsorted(jnp.cumsum(padded), tile_off, side="right"),
        E - 1).astype(jnp.int32)                             # expert per tile
    tile_rows = jnp.clip(grp_start[tile_gid] + counts[tile_gid] - tile_off,
                         0, tm).astype(jnp.int32)            # valid rows per tile

    # Gather routed tokens; stream operands in bf16 (f32 accumulation in-kernel).
    # TODO(synk): for decode-sized batches, scalar-prefetch `tok` and DMA-gather x
    # rows inside the kernel (x in pl.ANY) instead of materializing xs via XLA.
    xs = x[tok].astype(compute_dtype)                        # (R, D)
    w1c = w1.astype(compute_dtype)
    w3c = w3.astype(compute_dtype)
    w2c = w2.astype(compute_dtype)
    # TODO(synk): int8 (v5e/v6e) / fp8 (v7x) weight quantization would halve the
    # dominant weight-DMA stream in the few-tokens-per-expert regime.

    if weight_buffers != 2:
        def _wspec(shape, imap):
            return pl.BlockSpec(shape, imap, pipeline_mode=pl.Buffered(weight_buffers))
    else:
        def _wspec(shape, imap):
            return pl.BlockSpec(shape, imap)

    grid_spec = pltpu.PrefetchScalarGridSpec(
        num_scalar_prefetch=2,                 # tile_gid, tile_rows -> SMEM
        grid=(num_tiles, num_h),               # reduction (H) axis last
        in_specs=[
            pl.BlockSpec((tm, D), lambda t, h, gid, rows: (t, 0)),          # xs tile
            pl.BlockSpec((tm, 1), lambda t, h, gid, rows: (t, 0)),          # routing w
            _wspec((pl.Squeezed(), D, tH), lambda t, h, gid, rows: (gid[t], 0, h)),  # W1
            _wspec((pl.Squeezed(), D, tH), lambda t, h, gid, rows: (gid[t], 0, h)),  # W3
            _wspec((pl.Squeezed(), tH, D), lambda t, h, gid, rows: (gid[t], h, 0)),  # W2
        ],
        out_specs=pl.BlockSpec((tm, D), lambda t, h, gid, rows: (t, 0)),
        scratch_shapes=[pltpu.VMEM((tm, D), jnp.float32)],   # f32 accumulator
    )

    cost = pl.CostEstimate(
        flops=6 * R * D * H,                  # x@W1 + x@W3 + h@W2
        transcendentals=R * H,                # sigmoid
        bytes_accessed=2 * 3 * E * D * H + 2 * 2 * R * D + 4 * R,
    )

    ys = pl.pallas_call(
        _grouped_expert_kernel,
        out_shape=jax.ShapeDtypeStruct((R, D), compute_dtype),
        grid_spec=grid_spec,
        compiler_params=pltpu.CompilerParams(
            dimension_semantics=("parallel", "arbitrary"),   # tiles -> megacore
            vmem_limit_bytes=vmem_limit_bytes),
        cost_estimate=cost,
    )(tile_gid, tile_rows, xs, rw, w1c, w3c, w2c)

    # Scatter-add back to token order in f32; padded rows are exact zeros.
    out = jnp.zeros((T, D), jnp.float32).at[tok].add(ys.astype(jnp.float32))
    return out.astype(x.dtype)


# --------------------------- Pure-JAX reference -------------------------------
# Dense torch-style loop over experts with where-based routing weights; same
# compute dtype / f32 accumulation so the comparison isolates routing logic.

def moe_ref(x, wg, w1, w3, w2, k, compute_dtype=jnp.bfloat16):
    logits = jnp.dot(x, wg, preferred_element_type=jnp.float32)
    vals, idx = jax.lax.top_k(logits, k)
    wts = jax.nn.softmax(vals, axis=-1)                       # f32
    xc = x.astype(compute_dtype)
    out = jnp.zeros(x.shape, jnp.float32)
    E = w1.shape[0]
    for e in range(E):
        h1 = jnp.dot(xc, w1[e].astype(compute_dtype), preferred_element_type=jnp.float32)
        h3 = jnp.dot(xc, w3[e].astype(compute_dtype), preferred_element_type=jnp.float32)
        h = (h1 * jax.nn.sigmoid(h1)) * h3
        y = jnp.dot(h.astype(compute_dtype), w2[e].astype(compute_dtype),
                    preferred_element_type=jnp.float32)
        we = jnp.sum(jnp.where(idx == e, wts, 0.0), axis=1, keepdims=True)
        out = out + we * y
    return out.astype(x.dtype)


# ---------------------------------- Main --------------------------------------

if __name__ == "__main__":
    # small, TPU-friendly shapes
    T = 8      # tokens
    D = 128    # model dim
    H = 256    # expert hidden dim
    E = 8      # num_experts
    K = 2      # num_experts_per_tok

    key = jax.random.PRNGKey(0)
    kx, kg, k1, k3, k2 = jax.random.split(key, 5)

    x  = jax.random.normal(kx, (T, D), dtype=jnp.float32)
    wg = jax.random.normal(kg, (D, E), dtype=jnp.float32) * 0.02
    w1 = jax.random.normal(k1, (E, D, H), dtype=jnp.float32) * 0.02
    w3 = jax.random.normal(k3, (E, D, H), dtype=jnp.float32) * 0.02
    w2 = jax.random.normal(k2, (E, H, D), dtype=jnp.float32) * 0.02

    # Toy tiles to match the toy token count; at real sizes use
    # tm=128/256, tH=512 (v7x) or ~1024 (v5e/v6e).
    out = jax.block_until_ready(moe_pallas(x, wg, w1, w3, w2, K, tm=16, tH=128))
    ref = jax.block_until_ready(moe_ref(x, wg, w1, w3, w2, K))

    np.testing.assert_allclose(np.asarray(out), np.asarray(ref),
                               rtol=1e-2, atol=2e-3)
    print("KERNEL_OK")
</pallas_src>

<mosaic_0001>
module attributes {stable_mosaic.version = 11 : i64} {
  func.func @_grouped_expert_kernel(%arg0: i32, %arg1: i32, %arg2: memref<9xi32, #tpu.memory_space<smem>>, %arg3: memref<9xi32, #tpu.memory_space<smem>>, %arg4: memref<16x128xbf16, #tpu.memory_space<vmem>>, %arg5: memref<16x1xf32, #tpu.memory_space<vmem>>, %arg6: memref<1x128x128xbf16, #tpu.memory_space<vmem>>, %arg7: memref<1x128x128xbf16, #tpu.memory_space<vmem>>, %arg8: memref<1x128x128xbf16, #tpu.memory_space<vmem>>, %arg9: memref<16x128xbf16, #tpu.memory_space<vmem>>, %arg10: memref<16x128xf32, #tpu.memory_space<vmem>>) attributes {dimension_semantics = [#tpu.dimension_semantics<parallel>, #tpu.dimension_semantics<arbitrary>], iteration_bounds = array<i64: 9, 2>, scalar_prefetch = 2 : i64, scratch_operands = 1 : i64, tpu.core_type = #tpu.core_type<tc>, window_params = [{transform_indices = @transform_0, window_bounds = array<i64: 16, 128>}, {transform_indices = @transform_1, window_bounds = array<i64: 16, 1>}, {transform_indices = @transform_2, window_bounds = array<i64: 1, 128, 128>}, {transform_indices = @transform_3, window_bounds = array<i64: 1, 128, 128>}, {transform_indices = @transform_4, window_bounds = array<i64: 1, 128, 128>}, {transform_indices = @transform_5, window_bounds = array<i64: 16, 128>}]} {
    %c0_i32 = arith.constant 0 : i32
    %0 = arith.cmpi eq, %arg1, %c0_i32 : i32
    %1 = arith.extui %0 : i1 to i32
    %c0_i32_0 = arith.constant 0 : i32
    %2 = arith.cmpi ne, %1, %c0_i32_0 : i32
    scf.if %2 {
      %cst = arith.constant 0.000000e+00 : f32
      %11 = vector.broadcast %cst : f32 to vector<16x128xf32>
      %c0 = arith.constant 0 : index
      %c0_4 = arith.constant 0 : index
      %12 = vector.load %arg10[%c0, %c0_4] : memref<16x128xf32, #tpu.memory_space<vmem>>, vector<16x128xf32>
      tpu.vector_store %arg10[%c0, %c0_4], %11 {strides = array<i32>} : memref<16x128xf32, #tpu.memory_space<vmem>>, vector<16x128xf32>,
    } else {
    }
    %3 = arith.index_cast %arg0 : i32 to index
    %4 = memref.load %arg3[%3] : memref<9xi32, #tpu.memory_space<smem>>
    %c0_i32_1 = arith.constant 0 : i32
    %5 = arith.cmpi sgt, %4, %c0_i32_1 : i32
    %6 = arith.extui %5 : i1 to i32
    %c0_i32_2 = arith.constant 0 : i32
    %7 = arith.cmpi ne, %6, %c0_i32_2 : i32
    scf.if %7 {
      %c0 = arith.constant 0 : index
      %c0_4 = arith.constant 0 : index
      %11 = vector.load %arg4[%c0, %c0_4] : memref<16x128xbf16, #tpu.memory_space<vmem>>, vector<16x128xbf16>
      %c0_5 = arith.constant 0 : index
      %c0_6 = arith.constant 0 : index
      %c0_7 = arith.constant 0 : index
      %12 = vector.load %arg6[%c0_5, %c0_6, %c0_7] : memref<1x128x128xbf16, #tpu.memory_space<vmem>>, vector<1x128x128xbf16>
      %13 = vector.shape_cast %12 : vector<1x128x128xbf16> to vector<128x128xbf16>
      %cst = arith.constant dense<0.000000e+00> : vector<16x128xf32>
      %14 = tpu.matmul %11, %13, %cst {dimension_numbers = #tpu.dot_dimension_numbers<[1], [0], [0], [1], [0, 0, 1, 1], [], []>} : vector<16x128xbf16>, vector<128x128xbf16>, vector<16x128xf32> -> vector<16x128xf32>
      %c0_8 = arith.constant 0 : index
      %c0_9 = arith.constant 0 : index
      %c0_10 = arith.constant 0 : index
      %15 = vector.load %arg7[%c0_8, %c0_9, %c0_10] : memref<1x128x128xbf16, #tpu.memory_space<vmem>>, vector<1x128x128xbf16>
      %16 = vector.shape_cast %15 : vector<1x128x128xbf16> to vector<128x128xbf16>
      %cst_11 = arith.constant dense<0.000000e+00> : vector<16x128xf32>
      %17 = tpu.matmul %11, %16, %cst_11 {dimension_numbers = #tpu.dot_dimension_numbers<[1], [0], [0], [1], [0, 0, 1, 1], [], []>} : vector<16x128xbf16>, vector<128x128xbf16>, vector<16x128xf32> -> vector<16x128xf32>
      %18 = arith.negf %14 : vector<16x128xf32>
      %19 = math.exp %18 : vector<16x128xf32>
      %cst_12 = arith.constant 1.000000e+00 : f32
      %20 = vector.broadcast %cst_12 : f32 to vector<16x128xf32>
      %21 = arith.addf %20, %19 : vector<16x128xf32>
      %22 = arith.divf %20, %21 : vector<16x128xf32>
      %23 = arith.mulf %14, %22 : vector<16x128xf32>
      %24 = arith.mulf %23, %17 : vector<16x128xf32>
      %c0_13 = arith.constant 0 : index
      %c0_14 = arith.constant 0 : index
      %25 = vector.load %arg10[%c0_13, %c0_14] : memref<16x128xf32, #tpu.memory_space<vmem>>, vector<16x128xf32>
      %26 = arith.truncf %24 : vector<16x128xf32> to vector<16x128xbf16>
      %c0_15 = arith.constant 0 : index
      %c0_16 = arith.constant 0 : index
      %c0_17 = arith.constant 0 : index
      %27 = vector.load %arg8[%c0_15, %c0_16, %c0_17] : memref<1x128x128xbf16, #tpu.memory_space<vmem>>, vector<1x128x128xbf16>
      %28 = vector.shape_cast %27 : vector<1x128x128xbf16> to vector<128x128xbf16>
      %cst_18 = arith.constant dense<0.000000e+00> : vector<16x128xf32>
      %29 = tpu.matmul %26, %28, %cst_18 {dimension_numbers = #tpu.dot_dimension_numbers<[1], [0], [0], [1], [0, 0, 1, 1], [], []>} : vector<16x128xbf16>, vector<128x128xbf16>, vector<16x128xf32> -> vector<16x128xf32>
      %30 = arith.addf %25, %29 : vector<16x128xf32>
      %c0_19 = arith.constant 0 : index
      %c0_20 = arith.constant 0 : index
      %31 = vector.load %arg10[%c0_19, %c0_20] : memref<16x128xf32, #tpu.memory_space<vmem>>, vector<16x128xf32>
      tpu.vector_store %arg10[%c0_19, %c0_20], %30 {strides = array<i32>} : memref<16x128xf32, #tpu.memory_space<vmem>>, vector<16x128xf32>,
    } else {
    }
    %c1_i32 = arith.constant 1 : i32
    %8 = arith.cmpi eq, %arg1, %c1_i32 : i32
    %9 = arith.extui %8 : i1 to i32
    %c0_i32_3 = arith.constant 0 : i32
    %10 = arith.cmpi ne, %9, %c0_i32_3 : i32
    scf.if %10 {
      %c0 = arith.constant 0 : index
      %c0_4 = arith.constant 0 : index
      %11 = vector.load %arg5[%c0, %c0_4] : memref<16x1xf32, #tpu.memory_space<vmem>>, vector<16x1xf32>
      %c0_5 = arith.constant 0 : index
      %c0_6 = arith.constant 0 : index
      %12 = vector.load %arg10[%c0_5, %c0_6] : memref<16x128xf32, #tpu.memory_space<vmem>>, vector<16x128xf32>
      %cst = arith.constant 0.000000e+00 : f32
      %13 = vector.broadcast %cst : f32 to vector<16x1xf32>
      %14 = arith.cmpf ogt, %11, %13 : vector<16x1xf32>
      %15 = vector.broadcast %11 : vector<16x1xf32> to vector<16x128xf32>
      %16 = arith.mulf %12, %15 : vector<16x128xf32>
      %cst_7 = arith.constant 0.000000e+00 : f32
      %17 = vector.shape_cast %14 : vector<16x1xi1> to vector<16x1xi1>
      %18 = vector.broadcast %17 : vector<16x1xi1> to vector<16x128xi1>
      %19 = vector.broadcast %cst_7 : f32 to vector<16x128xf32>
      %20 = arith.select %18, %16, %19 : vector<16x128xi1>, vector<16x128xf32>
      %21 = arith.truncf %20 : vector<16x128xf32> to vector<16x128xbf16>
      %c0_8 = arith.constant 0 : index
      %c0_9 = arith.constant 0 : index
      %22 = vector.load %arg9[%c0_8, %c0_9] : memref<16x128xbf16, #tpu.memory_space<vmem>>, vector<16x128xbf16>
      tpu.vector_store %arg9[%c0_8, %c0_9], %21 {strides = array<i32>} : memref<16x128xbf16, #tpu.memory_space<vmem>>, vector<16x128xbf16>,
    } else {
    }
    return
  }
  func.func @transform_0(%arg0: i32, %arg1: i32, %arg2: memref<9xi32, #tpu.memory_space<smem>>, %arg3: memref<9xi32, #tpu.memory_space<smem>>) -> (i32, i32) {
    %c0_i32 = arith.constant 0 : i32
    %c0_i32_0 = arith.constant 0 : i32
    return %arg0, %c0_i32 : i32, i32
  }
  func.func @transform_1(%arg0: i32, %arg1: i32, %arg2: memref<9xi32, #tpu.memory_space<smem>>, %arg3: memref<9xi32, #tpu.memory_space<smem>>) -> (i32, i32) {
    %c0_i32 = arith.constant 0 : i32
    %c0_i32_0 = arith.constant 0 : i32
    return %arg0, %c0_i32 : i32, i32
  }
  func.func @transform_2(%arg0: i32, %arg1: i32, %arg2: memref<9xi32, #tpu.memory_space<smem>>, %arg3: memref<9xi32, #tpu.memory_space<smem>>) -> (i32, i32, i32) {
    %0 = arith.index_cast %arg0 : i32 to index
    %1 = memref.load %arg2[%0] : memref<9xi32, #tpu.memory_space<smem>>
    %c0_i32 = arith.constant 0 : i32
    %c0_i32_0 = arith.constant 0 : i32
    return %1, %c0_i32, %arg1 : i32, i32, i32
  }
  func.func @transform_3(%arg0: i32, %arg1: i32, %arg2: memref<9xi32, #tpu.memory_space<smem>>, %arg3: memref<9xi32, #tpu.memory_space<smem>>) -> (i32, i32, i32) {
    %0 = arith.index_cast %arg0 : i32 to index
    %1 = memref.load %arg2[%0] : memref<9xi32, #tpu.memory_space<smem>>
    %c0_i32 = arith.constant 0 : i32
    %c0_i32_0 = arith.constant 0 : i32
    return %1, %c0_i32, %arg1 : i32, i32, i32
  }
  func.func @transform_4(%arg0: i32, %arg1: i32, %arg2: memref<9xi32, #tpu.memory_space<smem>>, %arg3: memref<9xi32, #tpu.memory_space<smem>>) -> (i32, i32, i32) {
    %0 = arith.index_cast %arg0 : i32 to index
    %1 = memref.load %arg2[%0] : memref<9xi32, #tpu.memory_space<smem>>
    %c0_i32 = arith.constant 0 : i32
    %c0_i32_0 = arith.constant 0 : i32
    return %1, %arg1, %c0_i32 : i32, i32, i32
  }
  func.func @transform_5(%arg0: i32, %arg1: i32, %arg2: memref<9xi32, #tpu.memory_space<smem>>, %arg3: memref<9xi32, #tpu.memory_space<smem>>) -> (i32, i32) {
    %c0_i32 = arith.constant 0 : i32
    %c0_i32_0 = arith.constant 0 : i32
    return %arg0, %c0_i32 : i32, i32
  }
}

</mosaic_0001>

<bundles_post_ra>
// kernel: tpu_custom_call.1
= control target key start
LH: loop header
LB: loop body
LE: loop exit
PB: predicated region body
PF: predicated region fallthrough
CT: control target
= control target key end

     0   :  { %s2294_s0 = inlined_call_operand.vmem [shape: s32[9], index: 0, kind: input, shape index: {}]   ;;  %s2295_s2 = inlined_call_operand.vmem [shape: bf16[144,128], index: 2, kind: input, shape index: {}]   ;;  %s2296_s3 = inlined_call_operand.vmem [shape: f32[144,1], index: 3, kind: input, shape index: {}]   ;;  %s2297_s4 = inlined_call_operand.hbm [shape: bf16[8,128,256], index: 4, kind: input, shape index: {}]   ;;  %s2298_s5 = inlined_call_operand.hbm [shape: bf16[8,128,256], index: 5, kind: input, shape index: {}]   ;;  %s2299_s6 = inlined_call_operand.hbm [shape: bf16[8,256,128], index: 6, kind: input, shape index: {}]   ;;  %s2300_s7 = inlined_call_operand.hbm [shape: bf16[144,128], index: 7, kind: output, shape index: {}]   ;;  %s2301_s1 = inlined_call_operand.vmem [shape: s32[9], index: 1, kind: input, shape index: {}]  }
   0x1   :  { %2328 = sst [smem:[#allocation39_spill]] %s2295_s2  ;;  %s12_s26 = sshll.u32 %s2294_s0, 4  ;;  %s13_s26 = int_to_ptr.vmem [resolvable:$true] %s12_s26 }
   0x2   :  { %2329 = sst [smem:[#allocation40_spill]] %s2296_s3  ;;  %s16_s29 = sshll.u32 %s2301_s1, 4  ;;  %s17_s29 = int_to_ptr.vmem [resolvable:$true] %s16_s29 }
   0x3   :  { %2330 = sst [smem:[#allocation41_spill]] %s2297_s4  ;;  %s1359_s30 = scalar_lea.vmem %s13_s26, 16 }
   0x4   :  { %2331 = sst [smem:[#allocation42_spill]] %s2298_s5  ;;  %p1360_p0 = scmp.ne.s32.totalorder %s13_s26, %s1359_s30 }
   0x5   :  { %2332 = sst [smem:[#allocation43_spill]] %s2300_s7  ;;  %p1364_p1 = scmp.lt.s32.totalorder %s13_s26, %s13_s26 }
   0x6   :  { %p1365_p2 = scmp.lt.s32.totalorder %s1359_s30, %s1359_s30 }
   0x8   :  { %p1366_p3 = por %p1365_p2, %p1364_p1 }
   0xa   :  { %p1367_p4 = pnand %p1366_p3, %p1360_p0 }
   0xc   :  { %1370 = shalt.err (!%p1367_p4)  }
   0xd   :  { %s1655_s8 = smov [#allocation4]   ;;  %s1371_s9 = scalar_lea.vmem %s17_s29, 16 }
   0xe   :  { %15 = dma.vmem_to_smem %s13_s26, 16, %s1655_s8, [#allocation3] }
   0xf   :  { %p1372_p5 = scmp.ne.s32.totalorder %s17_s29, %s1371_s9  ;;  %p1376_p6 = scmp.lt.s32.totalorder %s17_s29, %s17_s29 }
  0x10   :  { %p1377_p7 = scmp.lt.s32.totalorder %s1371_s9, %s1371_s9 }
  0x12   :  { %p1378_p8 = por %p1377_p7, %p1376_p6 }
  0x14   :  { %p1379_p9 = pnand %p1378_p8, %p1372_p5 }
  0x16   :  { %1382 = shalt.err (!%p1379_p9)  }
  0x17   :  { %s1656_s0 = smov [#allocation5]  }
  0x18   :  { %19 = dma.vmem_to_smem %s17_s29, 16, %s1656_s0, [#allocation3] }
  0x19   :  { %1569 = dma.done.wait [#allocation3], 32 }
  0x1a   :  { %1570 = vsyncadd [#allocation3], 4294967264 }
  0x1b   :  { %21 = sfence }
  0x1c   :  { %22 = vsyncpa [#allocation7], 0 }
  0x1d   :  { %24 = vsyncpa [#allocation7 + $0x1], 0 }
  0x1e   :  { %25 = vsyncpa [#allocation10], 0 }
  0x1f   :  { %27 = vsyncpa [#allocation10 + $0x1], 0 }
  0x20   :  { %28 = vsyncpa [#allocation8], 0 }
  0x21   :  { %30 = vsyncpa [#allocation8 + $0x1], 0  ;;  %s1716_s1 = smov 0   ;;  %s1718_s10 = smov 0  }
  0x22   :  { %s1720_s11 = smov 0   ;;  %s1722_s12 = smov 0  }
  0x23   :  { %s1724_s13 = smov 0   ;;  %s1726_s14 = smov 0  }
  0x24   :  { %s1728_s15 = smov 0   ;;  %s1730_s16 = smov 0  }
  0x25   :  { %s1732_s17 = smov 0   ;;  %s1734_s18 = smov 0  }
  0x26   :  { %s1736_s19 = smov 0   ;;  %s1738_s20 = smov 0  }
  0x27   :  { %s1740_s21 = smov 0   ;;  %s1742_s22 = smov 0  }
  0x28   :  { %s1744_s23 = smov 0   ;;  %s1746_s24 = smov 0  }
  0x29   :  { %s1748_s25 = smov 0  }
  0x2a LB: > { %2333 = sst [smem:[#allocation24_spill]] %s1589_s1  ;;  %s1800_s26 = sadd.s32 4294967295, %s1653_s25   ;;  %s1653_s25 = sphi %s1748_s25, %s36_s25   ;;  %s1649_s24 = sphi %s1746_s24, %s2418_s24   ;;  %s1645_s23 = sphi %s1744_s23, %s2417_s23   ;;  %s1641_s22 = sphi %s1742_s22, %s2416_s22   ;;  %s1637_s21 = sphi %s1740_s21, %s2415_s21   ;;  %s1633_s20 = sphi %s1738_s20, %s2414_s20   ;;  %s1629_s19 = sphi %s1736_s19, %s2413_s19   ;;  %s1625_s18 = sphi %s1734_s18, %s2412_s18   ;;  %s1621_s17 = sphi %s1732_s17, %s2403_s17   ;;  %s1617_s16 = sphi %s1730_s16, %s2402_s16   ;;  %s1613_s15 = sphi %s1728_s15, %s2401_s15   ;;  %s1609_s14 = sphi %s1726_s14, %s2411_s14   ;;  %s1605_s13 = sphi %s1724_s13, %s2410_s13   ;;  %s1601_s12 = sphi %s1722_s12, %s2409_s12   ;;  %s1597_s11 = sphi %s1720_s11, %s2408_s11   ;;  %s1593_s10 = sphi %s1718_s10, %s2399_s10   ;;  %s1589_s1 = sphi %s1716_s1, %s2398_s1  }
  0x2b   : > { %2334 = sst [smem:[#allocation25_spill]] %s1593_s10  ;;  %s987_s27 = sadd.s32 4294967294, %s1653_s25  }
  0x2c   : > { %2335 = sst [smem:[#allocation26_spill]] %s1597_s11  ;;  %s45_s28 = sadd.s32 1, %s1645_s23 }
  0x2d   : > { %2336 = sst [smem:[#allocation27_spill]] %s1617_s16  ;;  %s48_s29 = sadd.s32 1, %s1649_s24 }
  0x2e   : > { %2337 = sst [smem:[#allocation28_spill]] %s1621_s17  ;;  %p46_p10 = scmp.ge.s32.totalorder %s45_s28, 2 }
  0x2f   : > { %2338 = sst [smem:[#allocation29_spill]] %s1637_s21  ;;  %p2317_p11 = scmp.eq.s32.totalorder %s1653_s25, 0 }
  0x30   : > { %2339 = sst [smem:[#allocation30_spill]] %s1641_s22  ;;  %p2316_p12 = scmp.eq.s32.totalorder %s1800_s26, 0 }
  0x31   : > { %s134_s30 = sld [smem:[#allocation4 + %s1649_s24]]  ;;  %s2420_s28 = smov (%p46_p10, %s45_s28), 0 }
  0x32   : > { %2340 = sst [smem:[#allocation31_spill]] %s2420_s28  ;;  %s2422_s29 = smov (!%p46_p10, %s48_s29), %s1649_s24 }
  0x33   : > { %s1813_s8 = ssub.s32 %s1645_s23, %s2420_s28  ;;  %s141_s9 = sadd.s32 1, %s1621_s17 }
  0x34   : > { %p50_p13 = scmp.ge.s32.totalorder %s2422_s29, 9  ;;  %p148_p0 = scmp.ne.s32.totalorder %s1621_s17, %s1617_s16 }
  0x35   : > { %p154_p1 = scmp.ne.s32.totalorder %s1617_s16, %s1613_s15  ;;  %s197_s0 = sadd.s32 1, %s1597_s11 }
  0x36   : > { %s2424_s29 = smov (%p50_p13, %s2422_s29), 0  ;;  %p1824_p2 = por %p148_p0, %p2317_p11 }
  0x37   : > { %2341 = sst [smem:[#allocation32_spill]] %s2424_s29  ;;  %p1830_p3 = por %p154_p1, %p2316_p12 }
  0x38   : > { %s135_s21 = sld [smem:[#allocation4 + %s2424_s29]]  ;;  %s194_s15 = ssub.s32 %s1649_s24, %s2424_s29 }
  0x39   : > { %s2343_s28 = scalar_select %p1830_p3, 1, 0 }
  0x3a   : > { %p195_p4 = scmp.eq.s32.totalorder %s194_s15, 0  ;;  %p207_p5 = scmp.ne.s32.totalorder %s1597_s11, %s1593_s10 }
  0x3b   : > { %2344 = sst [smem:[#allocation33_spill]] %s2343_s28  ;;  %p208_p6 = scmp.eq.s32.totalorder %s1800_s26, 17 }
  0x3c   : > { %p213_p7 = scmp.ne.s32.totalorder %s1593_s10, %s1589_s1  ;;  %p214_p9 = scmp.eq.s32.totalorder %s987_s27, 17 }
  0x3d   : > { %s1843_s3 = scalar_select %p195_p4, %s1597_s11, %s197_s0  }
  0x3e   : > { %p1845_p8 = por %p208_p6, %p207_p5  ;;  %p2315_p10 = scmp.lt.s32.totalorder %s1653_s25, 18 }
  0x3f   : > { %2345 = sst [smem:[#allocation34_spill]] %s1843_s3  ;;  %s136_s15 = ssub.s32 %s134_s30, %s135_s21 }
  0x40   : > { %s2346_s2 = scalar_select %p1845_p8, 1, 0 }
  0x41   : > { %p1850_p13 = por %p214_p9, %p213_p7  ;;  %s138_s28 = sor.u32 %s136_s15, %s1813_s8 }
  0x42   : > { %2347 = sst [smem:[#allocation35_spill]] %s2346_s2  ;;  %p139_p0 = scmp.eq.s32.totalorder %s138_s28, 0 }
  0x43   : > { %s2348_s22 = scalar_select %p1850_p13, 1, 0 }
  0x44   : > { %s275_s1 = sand.u32 1, %s1653_s25   ;;  %s277_s0 = sand.u32 1, %s1621_s17  }
  0x45   : > { %2349 = sst [smem:[#allocation36_spill]] %s2348_s22  ;;  %s993_s3 = sshll.u32 %s277_s0, 6 }
  0x46   : > { %s1857_s10 = scalar_select %p139_p0, %s1621_s17, %s141_s9  }
  0x47   : > { %p1864_p1 = pnand %p2315_p10, %p1824_p2  ;;  %p1000_p4 = scmp.ge.s32.totalorder %s1653_s25, 1 }
  0x48   : > { %2350 = sst [smem:[#allocation37_spill]] %s1857_s10  ;;  %s279_s28 = scalar_lea.vmem [#allocation9], %s993_s3 }
  0x49   : > { %s1144_s21 = scalar_select %p1824_p2, [#allocation4], [#allocation14] }
  0x4a   : > { %s1145_s30 = scalar_select %p1824_p2, %s1649_s24, 0 }
  0x4b   : > { %s2426_s21 = smov (!%p2315_p10, %s1144_s21), [#allocation17]  ;;  %s288_s9 = sshll.u32 %s279_s28, 4  ;;  %s1878_s9 = int_to_ptr.vmem [resolvable:$true] %s288_s9 }
  0x4c   : > { %s2428_s30 = smov (!%p2315_p10, %s1145_s30), 0  ;;  %p320_p5 = scmp.lt.s32.totalorder %s1653_s25, 19 }
  0x4d   : > { %s280_s15 = sld [smem:[%s2426_s21 + %s2428_s30]]  ;;  %s1897_s21 = scalar_lea.sflag [#allocation10], %s275_s1 }
  0x4e   : > { %p1881_p6 = pnand %p1000_p4, %p320_p5  ;;  %s1887_s11 = sld [smem:[#allocation4 + %s1649_s24]] }
  0x4f   : > { %s2353_s5 = sld [smem:[#allocation42_spill]]  ;;  %p1385_p7 = pneg %p1864_p1 }
  0x50   : > { %s2352_s0 = scalar_select %p1881_p6, 1, 0 }
  0x51   : > { %s1895_s3 = sld [smem:[#allocation4 + %s2424_s29]] }
  0x53   : > { %s994_s10 = sshll.u32 %s280_s15, 5 }
  0x54   : > { %s285_s17 = sadd.s32 %s1645_s23, %s994_s10 }
  0x55   : > { %s995_s7 = sshll.u32 %s285_s17, 6  ;;  %s1388_s17 = scalar_lea.hbm %s2353_s5, 16384 }
  0x56   : > { %s1892_s16 = scalar_lea.hbm %s2353_s5, %s995_s7 }
  0x57   : > { %s1383_s30 = scalar_lea.hbm %s1892_s16, 1024  ;;  %p1389_p4 = scmp.lt.u32.totalorder %s1892_s16, %s2353_s5 }
  0x58   : > { %p1384_p2 = scmp.ne.s32.totalorder %s1892_s16, %s1383_s30  ;;  %p1390_p5 = scmp.lt.u32.totalorder %s1388_s17, %s1383_s30 }
  0x59   : > { %p1392_p12 = scmp.lt.u32.totalorder %s1383_s30, %s1892_s16 }
  0x5a   : > { %p1386_p9 = pnand %p1385_p7, %p1384_p2  ;;  %p1391_p10 = por %p1390_p5, %p1389_p4 }
  0x5c   : > { %p1387_p0 = pneg %p1386_p9  ;;  %p1393_p11 = por %p1392_p12, %p1391_p10 }
  0x5e   : > { %p1394_p13 = pnand %p1393_p11, %p1387_p0 }
  0x60   : > { %1397 = shalt.err (!%p1394_p13)
}
  0x61   : > { %s1398_s1 = scalar_lea.vmem %s1878_s9, 1024  ;;  %s1657_s15 = smov [#allocation9]  }
  0x62   : > { %p1399_p2 = scmp.ne.s32.totalorder %s1878_s9, %s1398_s1  ;;  %s1403_s7 = sshll.u32 %s1657_s15, 4  ;;  %s1404_s7 = int_to_ptr.vmem [resolvable:$false] %s1403_s7 }
  0x63   : > { %s1405_s10 = scalar_lea.vmem %s1404_s7, 2048  ;;  %p1406_p3 = scmp.lt.s32.totalorder %s1878_s9, %s1404_s7 }
  0x64   : > { %p1401_p9 = pnand %p1399_p2, %p1385_p7  ;;  %p1407_p4 = scmp.lt.s32.totalorder %s1405_s10, %s1398_s1 }
  0x66   : > { %p1402_p8 = pneg %p1401_p9  ;;  %p1408_p5 = por %p1407_p4, %p1406_p3 }
  0x68   : > { %p1409_p12 = pnand %p1408_p5, %p1402_p8 }
  0x6a   : > { %1412 = shalt.err (!%p1409_p12)
}
  0x6b   : > { %s2320_s30 = smov 128   ;;  %s2321_s2 = smov 64  }
  0x6c   : > { %s2323_s17 = smov 4   ;;  %p118_p11 = scmp.ne.s32.totalorder %s1633_s20, %s1629_s19 }
  0x6d   : > { %1165 = dma.hbm_to_vmem [thread:$0]  (!%p1864_p1), %s1892_s16, 1024, %s1878_s9, %s1897_s21, %s2320_s30, %s2321_s2, %s2323_s17  }
  0x6e   : > { %p124_p3 = scmp.ne.s32.totalorder %s1629_s19, %s1625_s18  ;;  %s252_s22 = sand.u32 1, %s1633_s20  }
  0x6f   : > { %p2354_p8 = scmp.eq.s32.totalorder %s1653_s25, 0  ;;  %p2356_p13 = scmp.eq.s32.totalorder %s1800_s26, 0 }
  0x70   : > { %s990_s16 = sshll.u32 %s252_s22, 6  ;;  %s106_s18 = ssub.s32 %s1887_s11, %s1895_s3 }
  0x71   : > { %p1935_p10 = por %p2354_p8, %p118_p11  ;;  %p1941_p7 = por %p2356_p13, %p124_p3 }
  0x72   : > { %s108_s9 = sor.u32 %s1813_s8, %s106_s18  ;;  %s111_s1 = sadd.s32 1, %s1633_s20 }
  0x73   : > { %s2357_s27 = scalar_select %p1941_p7, 1, 0 }
  0x74   : > { %p109_p1 = scmp.eq.s32.totalorder %s108_s9, 0  ;;  %s256_s15 = scalar_lea.vmem [#allocation6], %s990_s16 }
  0x75   : > { %s265_s7 = sshll.u32 %s256_s15, 4  ;;  %p2359_p0 = scmp.lt.s32.totalorder %s1653_s25, 18  ;;  %s1979_s7 = int_to_ptr.vmem [resolvable:$true] %s265_s7 }
  0x76   : > { %s1141_s10 = scalar_select %p1935_p10, [#allocation4], [#allocation13] }
  0x77   : > { %s1952_s30 = scalar_select %p109_p1, %s1633_s20, %s111_s1  }
  0x78   : > { %s1142_s2 = scalar_select %p1935_p10, %s1649_s24, 0 }
  0x79   : > { %2358 = sst [smem:[#allocation38_spill]] %s1952_s30  ;;  %s2430_s10 = smov (!%p2359_p0, %s1141_s10), [#allocation16] }
  0x7a   : > { %p2360_p2 = pmov %p2359_p0  ;;  %p2361_p9 = pmov %p2359_p0 }
  0x7b   : > { %s1970_s16 = sld [smem:[#allocation4 + %s1649_s24]]  ;;  %p178_p5 = scmp.ne.s32.totalorder %s1609_s14, %s1605_s13 }
  0x7c   : > { %s2432_s2 = smov (!%p2360_p2, %s1142_s2), 0  ;;  %p1965_p4 = pnand %p2361_p9, %p1935_p10 }
  0x7d   : > { %s257_s3 = sld [smem:[%s2430_s10 + %s2432_s2]]  ;;  %p184_p12 = scmp.ne.s32.totalorder %s1605_s13, %s1601_s12 }
  0x7e   : > { %s1973_s18 = sld [smem:[#allocation4 + %s2424_s29]]  ;;  %p2363_p11 = pmov %p2356_p13 }
  0x7f   : > { %s2365_s4 = sld [smem:[#allocation41_spill]]  ;;  %p1996_p10 = por %p178_p5, %p2354_p8 }
  0x80   : > { %p1985_p3 = por %p184_p12, %p2363_p11  ;;  %p1415_p1 = pneg %p1965_p4 }
  0x82   : > { %s2364_s17 = scalar_select %p1985_p3, 1, 0 }
  0x83   : > { %s991_s9 = sshll.u32 %s257_s3, 5  ;;  %s2000_s3 = scalar_lea.sflag [#allocation7], %s252_s22 }
  0x84   : > { %s262_s1 = sadd.s32 %s1645_s23, %s991_s9 }
  0x85   : > { %s992_s28 = sshll.u32 %s262_s1, 6  ;;  %s1418_s2 = scalar_lea.hbm %s2365_s4, 16384 }
  0x86   : > { %s1992_s5 = scalar_lea.hbm %s2365_s4, %s992_s28 }
  0x87   : > { %s1413_s9 = scalar_lea.hbm %s1992_s5, 1024  ;;  %p1419_p9 = scmp.lt.u32.totalorder %s1992_s5, %s2365_s4 }
  0x88   : > { %p1414_p13 = scmp.ne.s32.totalorder %s1992_s5, %s1413_s9  ;;  %p1420_p5 = scmp.lt.u32.totalorder %s1418_s2, %s1413_s9 }
  0x89   : > { %p1422_p11 = scmp.lt.u32.totalorder %s1413_s9, %s1992_s5 }
  0x8a   : > { %p1416_p0 = pnand %p1415_p1, %p1414_p13  ;;  %p1421_p12 = por %p1420_p5, %p1419_p9 }
  0x8c   : > { %p1417_p2 = pneg %p1416_p0  ;;  %p1423_p8 = por %p1422_p11, %p1421_p12 }
  0x8e   : > { %p1424_p3 = pnand %p1423_p8, %p1417_p2 }
  0x90   : > { %1427 = shalt.err (!%p1424_p3)
}
  0x91   : > { %s1428_s22 = scalar_lea.vmem %s1979_s7, 1024  ;;  %s1661_s1 = smov [#allocation6]  }
  0x92   : > { %p1429_p13 = scmp.ne.s32.totalorder %s1979_s7, %s1428_s22  ;;  %s1433_s28 = sshll.u32 %s1661_s1, 4  ;;  %s1434_s28 = int_to_ptr.vmem [resolvable:$false] %s1433_s28 }
  0x93   : > { %s1435_s15 = scalar_lea.vmem %s1434_s28, 2048  ;;  %p1436_p6 = scmp.lt.s32.totalorder %s1979_s7, %s1434_s28 }
  0x94   : > { %p1431_p0 = pnand %p1429_p13, %p1415_p1  ;;  %p1437_p9 = scmp.lt.s32.totalorder %s1435_s15, %s1428_s22 }
  0x96   : > { %p1432_p7 = pneg %p1431_p0  ;;  %p1438_p5 = por %p1437_p9, %p1436_p6 }
  0x98   : > { %p1439_p12 = pnand %p1438_p5, %p1432_p7 }
  0x9a   : > { %1442 = shalt.err (!%p1439_p12)
}
  0x9b   : > { %s2367_s9 = smov 4   ;;  %s2368_s2 = smov 64  }
  0x9c   : > { %s2369_s10 = smov 128   ;;  %s166_s11 = ssub.s32 %s1970_s16, %s1973_s18 }
  0x9d   : > { %1160 = dma.hbm_to_vmem [thread:$0]  (!%p1965_p4), %s1992_s5, 1024, %s1979_s7, %s2000_s3, %s2369_s10, %s2368_s2, %s2367_s9  }
  0x9e   : > { %s168_s22 = sor.u32 %s166_s11, %s1813_s8  ;;  %s171_s1 = sadd.s32 1, %s1609_s14 }
  0x9f   : > { %p169_p6 = scmp.eq.s32.totalorder %s168_s22, 0  ;;  %s2370_s28 = sand.u32 1, %s1609_s14  }
  0xa0   : > { %s996_s15 = sshll.u32 %s2370_s28, 6  ;;  %p2371_p7 = scmp.lt.s32.totalorder %s1653_s25, 18 }
  0xa1   : > { %s1147_s4 = scalar_select %p1996_p10, [#allocation4], [#allocation15] }
  0xa2   : > { %s2040_s29 = scalar_select %p169_p6, %s1609_s14, %s171_s1  }
  0xa3   : > { %s1148_s30 = scalar_select %p1996_p10, %s1649_s24, 0 }
  0xa4   : > { %s2434_s4 = smov (!%p2371_p7, %s1147_s4), [#allocation18]  ;;  %p2372_p3 = pmov %p2371_p7 }
  0xa5   : > { %s997_s7 = sshll.u32 %s1645_s23, 4  ;;  %s302_s16 = scalar_lea.vmem [#allocation11], %s996_s15 }
  0xa6   : > { %s2436_s30 = smov (!%p2372_p3, %s1148_s30), 0  ;;  %p2373_p1 = pmov %p2372_p3 }
  0xa7   : > { %s303_s8 = sld [smem:[%s2434_s4 + %s2436_s30]]  ;;  %s312_s18 = sshll.u32 %s302_s16, 4  ;;  %s2058_s18 = int_to_ptr.vmem [resolvable:$true] %s312_s18 }
  0xa8   : > { %p2053_p2 = pnand %p2373_p1, %p1996_p10  ;;  %s1448_s15 = scalar_lea.hbm %s2299_s6, 16384 }
  0xaa   : > { %p1445_p10 = pneg %p2053_p2 }
  0xad   : > { %s998_s3 = sshll.u32 %s303_s8, 5 }
  0xae   : > { %s309_s10 = sadd.s32 %s998_s3, %s997_s7 }
  0xaf   : > { %s999_s11 = sshll.u32 %s309_s10, 6 }
  0xb0   : > { %s2063_s12 = scalar_lea.hbm %s2299_s6, %s999_s11 }
  0xb1   : > { %s1443_s28 = scalar_lea.hbm %s2063_s12, 1024  ;;  %p1449_p13 = scmp.lt.u32.totalorder %s2063_s12, %s2299_s6 }
  0xb2   : > { %p1444_p4 = scmp.ne.s32.totalorder %s2063_s12, %s1443_s28  ;;  %p1450_p0 = scmp.lt.u32.totalorder %s1448_s15, %s1443_s28 }
  0xb3   : > { %p1452_p5 = scmp.lt.u32.totalorder %s1443_s28, %s2063_s12 }
  0xb4   : > { %p1446_p11 = pnand %p1445_p10, %p1444_p4  ;;  %p1451_p9 = por %p1450_p0, %p1449_p13 }
  0xb6   : > { %p1447_p8 = pneg %p1446_p11  ;;  %p1453_p12 = por %p1452_p5, %p1451_p9 }
  0xb8   : > { %p1454_p6 = pnand %p1453_p12, %p1447_p8 }
  0xba   : > { %1457 = shalt.err (!%p1454_p6)
}
  0xbb   : > { %s1458_s16 = scalar_lea.vmem %s2058_s18, 1024  ;;  %s1662_s3 = smov [#allocation11]  }
  0xbc   : > { %p1459_p7 = scmp.ne.s32.totalorder %s2058_s18, %s1458_s16  ;;  %s1463_s10 = sshll.u32 %s1662_s3, 4  ;;  %s1464_s10 = int_to_ptr.vmem [resolvable:$false] %s1463_s10 }
  0xbd   : > { %s1465_s11 = scalar_lea.vmem %s1464_s10, 2048  ;;  %p1466_p4 = scmp.lt.s32.totalorder %s2058_s18, %s1464_s10 }
  0xbe   : > { %p1461_p3 = pnand %p1459_p7, %p1445_p10  ;;  %p1467_p11 = scmp.lt.s32.totalorder %s1465_s11, %s1458_s16 }
  0xc0   : > { %p1462_p1 = pneg %p1461_p3  ;;  %p1468_p13 = por %p1467_p11, %p1466_p4 }
  0xc2   : > { %p1469_p0 = pnand %p1468_p13, %p1462_p1 }
  0xc4   : > { %1472 = shalt.err (!%p1469_p0)
}
  0xc5   : > { %1170 = dma.hbm_to_vmem [thread:$0]  (!%p2053_p2), %s2063_s12, 1024, %s2058_s18, %s1897_s21, %s2368_s2, %s2368_s2, %s2367_s9  }
  0xc6   : > { %p2375_p10 = scmp.ne.s32.totalorder %s2352_s0, 0 }
  0xc7   : > { %s326_s22 = sand.u32 (!%p2375_p10), 1, %s1629_s19   ;;  %p2376_p8 = scmp.ne.s32.totalorder (!%p2375_p10), %s2357_s27, 0 }
  0xc8   : > { %324 = sbr.rel (%p2375_p10) target bundleno = 925 (0x39d), region = 40  ;;  %s1001_s1 = sshll.u32 (!%p2375_p10), %s326_s22, 6 }
  0xc9   : > { %s327_s28 = scalar_lea.sflag (!%p2375_p10), [#allocation7], %s326_s22  ;;  %s2097_s4 = scalar_lea.vmem (!%p2375_p10), [#allocation6], %s1001_s1 }
  0xcf   : > { %1572 = dma.done.wait (%p2376_p8), %s327_s28, 1024  }
  0xd0   : > { %1574 = vsyncadd (%p2376_p8), %s327_s28, 4294966272  ;;  %s2377_s5 = sld [smem:[#allocation27_spill]]  ;;  %s2378_s30 = sld [smem:[#allocation33_spill]] }
  0xd1   : > { %s335_s15 = sand.u32 1, %s1800_s26  }
  0xd2   : > { %s336_s0 = scalar_lea.sflag [#allocation10], %s335_s15 }
  0xd6   : > { %s337_s21 = sand.u32 1, %s2377_s5   ;;  %p2379_p2 = scmp.ne.s32.totalorder %s2378_s30, 0 }
  0xd7   : > { %s1002_s9 = sshll.u32 %s337_s21, 6 }
  0xd8   : > { %s2105_s2 = scalar_lea.vmem [#allocation9], %s1002_s9 }
  0xd9   : > { %1576 = dma.done.wait (%p2379_p2), %s336_s0, 1024  }
  0xda   : > { %1578 = vsyncadd (%p2379_p2), %s336_s0, 4294966272  ;;  %s346_s18 = sand.u32 1, %s1605_s13   ;;  %p2380_p9 = scmp.ne.s32.totalorder %s2364_s17, 0 }
  0xdb   : > { %s1003_s12 = sshll.u32 %s346_s18, 6 }
  0xdc   : > { %s2112_s27 = scalar_lea.vmem [#allocation11], %s1003_s12 }
  0xdd   : > { %1580 = dma.done.wait (%p2380_p9), %s336_s0, 1024  }
  0xde   : > { %1582 = vsyncadd (%p2380_p9), %s336_s0, 4294966272  ;;  %s2381_s26 = sld [smem:[#allocation25_spill]]  ;;  %s2382_s8 = sld [smem:[#allocation30_spill]] }
  0xdf   : > { %s2383_s28 = sld [smem:[#allocation39_spill]]  ;;  %s2384_s15 = sld [smem:[#allocation40_spill]] }
  0xe0   : > { %s2385_s0 = sld [smem:[#allocation29_spill]] }
  0xe4   : > { %s392_s7 = sand.u32 1, %s2381_s26   ;;  %s1005_s16 = sshll.u32 %s2382_s8, 1 }
  0xe5   : > { %s2122_s3 = sshll.u32 %s392_s7, 3  ;;  %p396_p5 = scmp.lt.s32.totalorder %s1005_s16, 17 }
  0xe6   : > { %s394_s9 = scalar_lea.vmem [#allocation12], %s2122_s3  ;;  %p1009_p12 = scmp.ne.s32.totalorder %s2385_s0, 0 }
  0xe7   : > { %s2438_s16 = smov (!%p396_p5, %s1005_s16), 17  ;;  %v1663_v0 = vmov (!%p1009_p12), 0.0  }
  0xe8   : > { %s1006_s10 = sshll.u32 %s2438_s16, 2  ;;  %s1008_s11 = sshll.u32 %s2438_s16, 3  ;;  %417 = vst [vmem:[#allocation2] sm:$0xff] (!%p1009_p12), %v1663_v0  ;;  %418 = vst [vmem:[#allocation2 + $0x8] sm:$0xff] (!%p1009_p12), %v1663_v0 }
  0xe9   : > { %s2127_s5 = scalar_lea.vmem %s2383_s28, %s1006_s10  ;;  %s2132_s21 = scalar_lea.vmem %s2384_s15, %s1008_s11 }
  0xea   : > { %416 = sbr.rel (%p1009_p12) target bundleno = 241 (0xf1), region = 56 }
  0xf1 PF: > { %s2386_s18 = sld [smem:[#allocation30_spill]] }
  0xf7   : > { %s419_s12 = sld [smem:[#allocation5 + %s2386_s18]] }
  0xfd   : > { %p1010_p6 = scmp.le.s32.totalorder %s419_s12, 0 }
  0xfe   : > { %v1324_v1 = vld [vmem:[%s2097_s4] sm:$0xff] (!%p1010_p6)   ;;  %v1664_v2 = vmov (!%p1010_p6), 0.0   ;;  %v1325_v3 = vld [vmem:[%s2097_s4 + $0x8] sm:$0xff] (!%p1010_p6)   ;;  %vm1665_vm0 = vmmov (!%p1010_p6), 0   ;;  %v1326_v4 = vld [vmem:[%s2097_s4 + $0x10] sm:$0xff] (!%p1010_p6)  }
  0xff   : > { %423 = sbr.rel (%p1010_p6) target bundleno = 750 (0x2ee), region = 60  ;;  %1081 = vmatprep.subr.bf16.mxu0 (!%p1010_p6), %v1664_v2  ;;  %1101 = vmatprep.subr.bf16.mxu1 (!%p1010_p6), %v1664_v2  ;;  %v1331_v5 = vld [vmem:[%s2105_s2] sm:$0xff] (!%p1010_p6)   ;;  %v1333_v6 = vld [vmem:[%s2105_s2 + $0x8] sm:$0xff] (!%p1010_p6)   ;;  %v1327_v7 = vld [vmem:[%s2097_s4 + $0x18] sm:$0xff] (!%p1010_p6)  }
 0x100   : > { %1082 = vmatpush3.bf16.msra.mxu0 (!%p1010_p6), %v1324_v1  ;;  %1097 = vmatprep.mubr.msk.bf16.mxu0 (!%p1010_p6), %vm1665_vm0, %v1664_v2  ;;  %v1335_v8 = vld [vmem:[%s2105_s2 + $0x10] sm:$0xff] (!%p1010_p6)   ;;  %v1328_v9 = vld [vmem:[%s2097_s4 + $0x20] sm:$0xff] (!%p1010_p6)   ;;  %v1329_v10 = vld [vmem:[%s2097_s4 + $0x28] sm:$0xff] (!%p1010_p6)  }
 0x101   : > { %1083 = vmatprep.subr.bf16.mxu0 (!%p1010_p6), %v1664_v2  ;;  %1117 = vmatprep.mubr.msk.bf16.mxu1 (!%p1010_p6), %vm1665_vm0, %v1664_v2  ;;  %v1336_v11 = vld [vmem:[%s2105_s2 + $0x18] sm:$0xff] (!%p1010_p6)   ;;  %v1337_v12 = vld [vmem:[%s2105_s2 + $0x20] sm:$0xff] (!%p1010_p6)   ;;  %v1330_v13 = vld [vmem:[%s2097_s4 + $0x30] sm:$0xff] (!%p1010_p6)  }
 0x102   : > { %1102 = vmatpush3.bf16.msra.mxu1 (!%p1010_p6), %v1331_v5  ;;  %v1338_v14 = vld [vmem:[%s2105_s2 + $0x28] sm:$0xff] (!%p1010_p6)   ;;  %v1332_v15 = vld [vmem:[%s2097_s4 + $0x38] sm:$0xff] (!%p1010_p6)   ;;  %v1334_v16 = vld [vmem:[%s2127_s5] sm:$0xff] (!%p1010_p6)  }
 0x103   : > { %1103 = vmatprep.subr.bf16.mxu1 (!%p1010_p6), %v1664_v2  ;;  %v1339_v17 = vld [vmem:[%s2105_s2 + $0x30] sm:$0xff] (!%p1010_p6)   ;;  %v1340_v18 = vld [vmem:[%s2105_s2 + $0x38] sm:$0xff] (!%p1010_p6)   ;;  %v1341_v19 = vld [vmem:[%s2112_s27] sm:$0xff] (!%p1010_p6)  }
 0x104   : > { %1084 = vmatpush3.bf16.msra.mxu0 (!%p1010_p6), %v1325_v3  ;;  %v1342_v20 = vld [vmem:[%s2112_s27 + $0x8] sm:$0xff] (!%p1010_p6)   ;;  %v1343_v21 = vld [vmem:[%s2112_s27 + $0x10] sm:$0xff] (!%p1010_p6)   ;;  %v1344_v22 = vld [vmem:[%s2112_s27 + $0x18] sm:$0xff] (!%p1010_p6)  }
 0x105   : > { %1085 = vmatprep.subr.bf16.mxu0 (!%p1010_p6), %v1664_v2  ;;  %v1345_v23 = vld [vmem:[%s2112_s27 + $0x20] sm:$0xff] (!%p1010_p6)   ;;  %v1346_v24 = vld [vmem:[%s2112_s27 + $0x28] sm:$0xff] (!%p1010_p6)   ;;  %v1347_v25 = vld [vmem:[%s2112_s27 + $0x30] sm:$0xff] (!%p1010_p6)  }
 0x106   : > { %1104 = vmatpush3.bf16.msra.mxu1 %v1333_v6  ;;  %v1348_v26 = vld [vmem:[%s2112_s27 + $0x38] sm:$0xff]   ;;  %v658_v48 = vld [vmem:[#allocation2] sm:$0xff] }
 0x107   : > { %1105 = vmatprep.subr.bf16.mxu1 %v1664_v2  ;;  %v659_v50 = vld [vmem:[#allocation2 + $0x8] sm:$0xff] }
 0x108   : > { %1086 = vmatpush3.bf16.msra.mxu0 %v1326_v4 }
 0x109   : > { %1087 = vmatprep.subr.bf16.mxu0 %v1664_v2 }
 0x10a   : > { %1106 = vmatpush3.bf16.msra.mxu1 %v1335_v8 }
 0x10b   : > { %1107 = vmatprep.subr.bf16.mxu1 %v1664_v2 }
 0x10c   : > { %1088 = vmatpush3.bf16.msra.mxu0 %v1327_v7 }
 0x10d   : > { %1089 = vmatprep.subr.bf16.mxu0 %v1664_v2 }
 0x10e   : > { %1108 = vmatpush3.bf16.msra.mxu1 %v1336_v11 }
 0x10f   : > { %1109 = vmatprep.subr.bf16.mxu1 %v1664_v2 }
 0x110   : > { %1090 = vmatpush3.bf16.msra.mxu0 %v1328_v9 }
 0x111   : > { %1091 = vmatprep.subr.bf16.mxu0 %v1664_v2 }
 0x112   : > { %1110 = vmatpush3.bf16.msra.mxu1 %v1337_v12 }
 0x113   : > { %1111 = vmatprep.subr.bf16.mxu1 %v1664_v2 }
 0x114   : > { %1092 = vmatpush3.bf16.msra.mxu0 %v1329_v10 }
 0x115   : > { %1093 = vmatprep.subr.bf16.mxu0 %v1664_v2 }
 0x116   : > { %1112 = vmatpush3.bf16.msra.mxu1 %v1338_v14 }
 0x117   : > { %1113 = vmatprep.subr.bf16.mxu1 %v1664_v2 }
 0x118   : > { %1094 = vmatpush3.bf16.msra.mxu0 %v1330_v13 }
 0x119   : > { %1095 = vmatprep.subr.bf16.mxu0 %v1664_v2 }
 0x11a   : > { %1114 = vmatpush3.bf16.msra.mxu1 %v1339_v17 }
 0x11b   : > { %1115 = vmatprep.subr.bf16.mxu1 %v1664_v2 }
 0x11c   : > { %1096 = vmatpush3.bf16.msra.mxu0 %v1332_v15 }
 0x11d   : > { %1121 = vmatprep.subr.bf16.mxu0 %v1664_v2 }
 0x11e   : > { %1116 = vmatpush3.bf16.msra.mxu1 %v1340_v18 }
 0x11f   : > { %1098 = vmatmul.mubr.bf16.vlgmr.msra.gmra.mrb[0].mxu0 %v1334_v16 }
 0x120   : > { %1137 = vmatprep.mubr.msk.bf16.mxu0 %vm1665_vm0, %v1664_v2  ;;  %1122 = vmatpush3.bf16.msra.mxu0 %v1341_v19 }
 0x121   : > { %1118 = vmatmul.mubr.bf16.vlgmr.msra.gmra.mrb[0].mxu1 %v1334_v16  ;;  %1123 = vmatprep.subr.bf16.mxu0 %v1664_v2 }
 0x124   : > { %1124 = vmatpush3.bf16.msra.mxu0 %v1342_v20 }
 0x125   : > { %1125 = vmatprep.subr.bf16.mxu0 %v1664_v2 }
 0x128   : > { %1126 = vmatpush3.bf16.msra.mxu0 %v1343_v21 }
 0x129   : > { %1127 = vmatprep.subr.bf16.mxu0 %v1664_v2 }
 0x12c   : > { %1128 = vmatpush3.bf16.msra.mxu0 %v1344_v22 }
 0x12d   : > { %1129 = vmatprep.subr.bf16.mxu0 %v1664_v2 }
 0x130   : > { %1130 = vmatpush3.bf16.msra.mxu0 %v1345_v23 }
 0x131   : > { %1131 = vmatprep.subr.bf16.mxu0 %v1664_v2 }
 0x134   : > { %1132 = vmatpush3.bf16.msra.mxu0 %v1346_v24 }
 0x135   : > { %1133 = vmatprep.subr.bf16.mxu0 %v1664_v2 }
 0x138   : > { %1134 = vmatpush3.bf16.msra.mxu0 %v1347_v25 }
 0x139   : > { %1135 = vmatprep.subr.bf16.mxu0 %v1664_v2 }
 0x13c   : > { %1136 = vmatpush3.bf16.msra.mxu0 %v1348_v26 }
 0x1f2   : > { %v530_v27 = vpop.f32.mrb[0].mxu0 }
 0x1f3   : > { %v1028_v28 = vmul.f32 -1.442695, %v530_v27  ;;  %v1099_v29 = vpop.f32.mrb[1].mxu0 }
 0x1f4   : > { %v533_v30 = vpop.f32.mrb[2].mxu0  ;;  %v635_v33 = vpop.f32.mrb[0].mxu1 }
 0x1f5   : > { %1349 = vpow2.f32 %v1028_v28  ;;  %v1029_v31 = vmul.f32 -1.442695, %v533_v30  ;;  %v1100_v32 = vpop.f32.mrb[3].mxu0  ;;  %v1119_v34 = vpop.f32.mrb[1].mxu1 }
 0x1f6   : > { %v638_v35 = vpop.f32.mrb[2].mxu1 }
 0x1f7   : > { %1351 = vpow2.f32 %v1029_v31  ;;  %v1120_v36 = vpop.f32.mrb[3].mxu1 }
 0x1ff   : > { %v1350_v37 = vpop.eup %1349 }
 0x200   : > { %v648_v38 = vadd.f32 1.0, %v1350_v37 }
 0x201   : > { %v1352_v39 = vpop.eup %1351 }
 0x202   : > { %1353 = vrcp.f32 %v648_v38  ;;  %v649_v40 = vadd.f32 1.0, %v1352_v39 }
 0x204   : > { %1355 = vrcp.f32 %v649_v40 }
 0x20c   : > { %v1354_v41 = vpop.eup %1353 }
 0x20d   : > { %v654_v42 = vmul.f32 %v1354_v41, %v530_v27 }
 0x20e   : > { %v1356_v43 = vpop.eup %1355 }
 0x20f   : > { %v655_v44 = vmul.f32 %v1356_v43, %v533_v30  ;;  %v656_v45 = vmul.f32 %v654_v42, %v635_v33 }
 0x211   : > { %v657_v46 = vmul.f32 %v655_v44, %v638_v35 }
 0x213   : > { %v660_v47 = vpack.c.bf16 %v657_v46, %v656_v45 }
 0x215   : > { %1138 = vmatmul.mubr.bf16.vlgmr.msra.gmra.mrb[4].mxu0 %v660_v47 }
 0x2e8   : > { %v759_v49 = vpop.f32.mrb[4].mxu0 }
 0x2e9   : > { %v766_v51 = vadd.f32 %v759_v49, %v658_v48  ;;  %v1139_v52 = vpop.f32.mrb[5].mxu0 }
 0x2ea   : > { %v762_v53 = vpop.f32.mrb[6].mxu0 }
 0x2eb   : > { %768 = vst [vmem:[#allocation2] sm:$0xff] %v766_v51  ;;  %v767_v54 = vadd.f32 %v762_v53, %v659_v50  ;;  %v1140_v55 = vpop.f32.mrb[7].mxu0 }
 0x2ed   : > { %769 = vst [vmem:[#allocation2 + $0x8] sm:$0xff] %v767_v54 }
 0x2ee PF: > { %s2387_s4 = sld [smem:[#allocation29_spill]] }
 0x2f4   : > { %p1038_p7 = scmp.ne.s32.totalorder %s2387_s4, 1 }
 0x2f5   : > { %v774_v56 = vld [vmem:[%s2132_s21] sm:$0xff] (!%p1038_p7)  ;;  %v775_v57 = vld [vmem:[%s2132_s21 + $0x8] sm:$0xff] (!%p1038_p7)  ;;  %v1666_v58 = vmov (!%p1038_p7), 0  }
 0x2f6   : > { %773 = sbr.rel (%p1038_p7) target bundleno = 897 (0x381), region = 64  ;;  %1357 = vset.pattern.permute.xlu0 (!%p1038_p7), %v1666_v58  ;;  %1358 = vset.pattern.permute.xlu1 (!%p1038_p7), %v1666_v58  ;;  %vm778_vm1 = vcmp.gt.f32.partialorder (!%p1038_p7), %v774_v56, 0.0  ;;  %vm779_vm2 = vcmp.gt.f32.partialorder (!%p1038_p7), %v775_v57, 0.0  ;;  %v776_v61 = vld [vmem:[#allocation2] sm:$0xff] (!%p1038_p7)  ;;  %v777_v0 = vld [vmem:[#allocation2 + $0x8] sm:$0xff] (!%p1038_p7) }
 0x2f7   : > { %782 = vperm.xlu0 (!%p1038_p7), %1357, %v774_v56   ;;  %v792_v59 = vsel (!%p1038_p7), %vm778_vm1, 1, %v1666_v58  ;;  %v793_v60 = vsel (!%p1038_p7), %vm779_vm2, 1, %v1666_v58 }
 0x2f8   : > { %795 = vperm.xlu1 (!%p1038_p7), %1358, %v792_v59  }
 0x2fb   : > { %787 = vperm.xlu0 (!%p1038_p7), %1357, %v775_v57  }
 0x2fc   : > { %798 = vperm.xlu1 (!%p1038_p7), %1358, %v793_v60  }
 0x376   : > { %v783_v62 = vpop.permute.xlu0 %782 }
 0x377   : > { %v796_v63 = vpop.permute.xlu1 %795  ;;  %v790_v1 = vmul.f32 %v783_v62, %v776_v61 }
 0x378   : > { %vm800_vm3 = vcmp.eq.s32.totalorder %v796_v63, 1 }
 0x379   : > { %v802_v5 = vsel %vm800_vm3, %v790_v1, 0.0 }
 0x37a   : > { %v788_v2 = vpop.permute.xlu0 %787 }
 0x37b   : > { %v791_v3 = vmul.f32 %v788_v2, %v777_v0  ;;  %v799_v4 = vpop.permute.xlu1 %798 }
 0x37c   : > { %vm801_vm4 = vcmp.eq.s32.totalorder %v799_v4, 1 }
 0x37d   : > { %v803_v6 = vsel %vm801_vm4, %v791_v3, 0.0 }
 0x37e   : > { %v1052_v7 = vpack.c.bf16 %v803_v6, %v802_v5 }
 0x380   : > { %1053 = vst [vmem:[%s394_s9] sm:$0xff] %v1052_v7  }
 0x381 PF: > { %s2388_s2 = sld [smem:[#allocation30_spill]]  ;;  %s2390_s26 = sld [smem:[#allocation35_spill]] }
 0x382   : > { %s2391_s11 = sld [smem:[#allocation43_spill]]  ;;  %s828_s1 = sshll.u32 %s394_s9, 4  ;;  %s2205_s1 = int_to_ptr.vmem [resolvable:$true] %s828_s1 }
 0x383   : > { %s2209_s5 = scalar_lea.sflag [#allocation8], %s392_s7  ;;  %s1473_s17 = scalar_lea.vmem %s2205_s1, 128 }
 0x384   : > { %p1474_p3 = scmp.ne.s32.totalorder %s2205_s1, %s1473_s17  ;;  %s1667_s30 = smov [#allocation12]  }
 0x385   : > { %s1477_s15 = sshll.u32 %s1667_s30, 4  ;;  %s1478_s15 = int_to_ptr.vmem [resolvable:$false] %s1477_s15 }
 0x386   : > { %s1479_s21 = scalar_lea.vmem %s1478_s15, 256  ;;  %p1480_p13 = scmp.lt.s32.totalorder %s2205_s1, %s1478_s15 }
 0x387   : > { %s1048_s8 = sshll.u32 %s2388_s2, 7  ;;  %p2393_p1 = scmp.ne.s32.totalorder %s2390_s26, 0 }
 0x388   : > { %s2392_s28 = smov %s2391_s11  ;;  %s2201_s22 = scalar_lea.hbm %s2391_s11, %s1048_s8 }
 0x389   : > { %p1475_p4 = pnand %p1474_p3, %p2393_p1  ;;  %p1481_p0 = scmp.lt.s32.totalorder %s1479_s21, %s1473_s17 }
 0x38b   : > { %p1476_p11 = pneg %p1475_p4  ;;  %p1482_p10 = por %p1481_p0, %p1480_p13 }
 0x38d   : > { %p1483_p8 = pnand %p1482_p10, %p1476_p11 }
 0x38f   : > { %1486 = shalt.err (!%p1483_p8)
}
 0x390   : > { %s1487_s7 = scalar_lea.hbm %s2201_s22, 128  ;;  %s1491_s0 = scalar_lea.hbm %s2392_s28, 1152 }
 0x391   : > { %p1488_p2 = scmp.ne.s32.totalorder %s2201_s22, %s1487_s7  ;;  %p1492_p12 = scmp.lt.u32.totalorder %s2201_s22, %s2392_s28 }
 0x392   : > { %p1493_p6 = scmp.lt.u32.totalorder %s1491_s0, %s1487_s7  ;;  %p1495_p3 = scmp.lt.u32.totalorder %s1487_s7, %s2201_s22 }
 0x393   : > { %p1489_p9 = pnand %p1488_p2, %p2393_p1 }
 0x394   : > { %p1494_p7 = por %p1493_p6, %p1492_p12 }
 0x395   : > { %p1490_p5 = pneg %p1489_p9 }
 0x396   : > { %p1496_p4 = por %p1495_p3, %p1494_p7 }
 0x398   : > { %p1497_p11 = pnand %p1496_p4, %p1490_p5 }
 0x39a   : > { %1500 = shalt.err (!%p1497_p11)
}
 0x39b   : > { %s1668_s4 = smov 64   ;;  %s1669_s2 = smov 4  }
 0x39c   : > { %1153 = dma.vmem_to_hbm [thread:$0]  (%p2393_p1), %s2205_s1, 128, %s2201_s22, %s2209_s5, %s1668_s4, %s1668_s4, %s1669_s2  }
 0x39d PF: > { %s2394_s27 = sld [smem:[#allocation24_spill]]  ;;  %s2395_s8 = sld [smem:[#allocation36_spill]] }
 0x39e   : > { %p1176_p13 = scmp.ge.s32.totalorder %s1653_s25, 2 }
 0x3a3   : > { %s843_s16 = sand.u32 1, %s2394_s27   ;;  %p2396_p0 = scmp.ne.s32.totalorder %s2395_s8, 0 }
 0x3a4   : > { %s844_s10 = scalar_lea.sflag [#allocation8], %s843_s16 }
 0x3a5   : > { %p1172_p10 = pnand %p1176_p13, %p2396_p0 }
 0x3a7   : > { %1584 = dma.done.wait (!%p1172_p10), %s844_s10, 128  }
 0x3a8   : > { %1586 = vsyncadd (!%p1172_p10), %s844_s10, 4294967168  ;;  %s36_s25 = sadd.s32 1, %s1653_s25   ;;  %s2398_s1 = sld [smem:[#allocation25_spill]] }
 0x3a9   : > { %p2238_p8 = scmp.ge.s32.totalorder %s36_s25, 20   ;;  %s2399_s10 = sld [smem:[#allocation26_spill]] }
 0x3aa   : > { %s2400_s26 = sld [smem:[#allocation34_spill]]  ;;  %s2401_s15 = sld [smem:[#allocation27_spill]] }
 0x3ab   : > { %s2402_s16 = sld [smem:[#allocation28_spill]]  ;;  %s2403_s17 = sld [smem:[#allocation37_spill]] }
 0x3ac   : > { %s2404_s22 = sld [smem:[#allocation38_spill]]  ;;  %s2405_s5 = sld [smem:[#allocation31_spill]] }
 0x3ad   : > { %s2406_s30 = sld [smem:[#allocation32_spill]]  ;;  %s2409_s12 = smov %s1605_s13 }
 0x3ae   : > { %s2410_s13 = smov %s1609_s14  ;;  %s2411_s14 = smov %s2040_s29 }
 0x3af   : > { %s2412_s18 = smov %s1629_s19  ;;  %s2413_s19 = smov %s1633_s20 }
 0x3b0   : > { %s2408_s11 = smov %s2400_s26  ;;  %s2415_s21 = smov %s1645_s23 }
 0x3b1   :  { %35 = sbr.rel (!%p2238_p8) target bundleno = 42 (0x2a), region = 127 }
 0x3b2   : > { %s2414_s20 = smov %s2404_s22  ;;  %s2416_s22 = smov %s1649_s24 }
 0x3b3   : > { %s2417_s23 = smov %s2405_s5  ;;  %s2418_s24 = smov %s2406_s30 }
 0x3b8   :  { %849 = vsyncpa [#allocation7], 1 }
 0x3b9   :  { %851 = vsyncpa [#allocation7 + $0x1], 1 }
 0x3ba   :  { %852 = vsyncpa [#allocation10], 1 }
 0x3bb   :  { %854 = vsyncpa [#allocation10 + $0x1], 1 }
 0x3bc   :  { %855 = vsyncpa [#allocation8], 1 }
 0x3bd   :  { %857 = vsyncpa [#allocation8 + $0x1], 1 }

</bundles_post_ra>
